<compile_context>
chip_gen: v6e
topology: v6e:2x2x1
jax: 0.10.0
libtpu: 0.0.40
codegen_flags: <defaults>
</compile_context>

<pallas_src>
import functools

import jax
import jax.numpy as jnp
import numpy as np
from jax import lax
from jax.experimental import pallas as pl
from jax.experimental.pallas import tpu as pltpu

LANE = 128  # TPU lane width; matmul output columns are padded to this.


# ---------------------------------------------------------------------------
# Small helpers
# ---------------------------------------------------------------------------

def _round_up(a, b):
    return (a + b - 1) // b * b


def _pick_row_tile(n_rows, tn_max=512):
    """Largest row tile <= tn_max (multiple of 16), keeping >= 2 grid steps
    when the problem allows it (megacore / 2-TC chips)."""
    if n_rows >= 2 * tn_max:
        return tn_max
    return max(16, _round_up(-(-n_rows // 2), 16))


def _pad_rows(a, n_pad):
    n = a.shape[0]
    if n_pad == n:
        return a
    return jnp.pad(a, ((0, n_pad - n), (0, 0)))


def _pad_cols_to(a, c_pad):
    c = a.shape[-1]
    if c == c_pad:
        return a
    return jnp.pad(a, ((0, 0), (0, c_pad - c)))


# ---------------------------------------------------------------------------
# Pallas kernels
# ---------------------------------------------------------------------------

def _offset_mod_kernel(p_ref, w_ref, b_ref, o_ref, *, n_off, n_mod):
    """Fused offset_conv + modulator_conv: one MXU pass over the im2col tile.

    Global output columns [0, n_off) are raw offsets, columns
    [n_off, n_off + n_mod) get the 2*sigmoid modulation; remaining columns are
    lane padding (zeros).
    """
    r = (jnp.dot(p_ref[...], w_ref[...], preferred_element_type=jnp.float32)
         + b_ref[...])
    col = (pl.program_id(1) * LANE
           + lax.broadcasted_iota(jnp.int32, r.shape, 1))
    is_mod = (col >= n_off) & (col < n_off + n_mod)
    o_ref[...] = jnp.where(is_mod, 2.0 * jax.nn.sigmoid(r), r)


def _deform_matmul_kernel(p_ref, w_ref, b_ref, o_ref):
    """regular_conv hot path: bf16 x bf16 matmul, f32 accumulation, fused bias."""
    o_ref[...] = (jnp.dot(p_ref[...], w_ref[...],
                          preferred_element_type=jnp.float32)
                  + b_ref[...])


# ---------------------------------------------------------------------------
# Pallas call wrappers
# ---------------------------------------------------------------------------

_COMPILER_PARAMS = pltpu.CompilerParams(
    dimension_semantics=("parallel", "parallel"),
    # Tiles here are small; 32 MiB is >= the default scoped limit on every
    # generation (raises v5e's 16 MiB default) and well under v7x's 64 MiB.
    vmem_limit_bytes=32 * 1024 * 1024,
)


def _offset_mod_conv(patches_bf16, w_cat, b_cat, n_off, n_mod, tn):
    n_pad, kkc = patches_bf16.shape
    c_pad = w_cat.shape[1]
    kernel = functools.partial(_offset_mod_kernel, n_off=n_off, n_mod=n_mod)
    return pl.pallas_call(
        kernel,
        out_shape=jax.ShapeDtypeStruct((n_pad, c_pad), jnp.float32),
        grid=(n_pad // tn, c_pad // LANE),
        in_specs=[pl.BlockSpec((tn, kkc), lambda i, j: (i, 0)),
                  pl.BlockSpec((kkc, LANE), lambda i, j: (0, j)),
                  pl.BlockSpec((1, LANE), lambda i, j: (0, j))],
        out_specs=pl.BlockSpec((tn, LANE), lambda i, j: (i, j)),
        compiler_params=_COMPILER_PARAMS,
    )(patches_bf16, w_cat, b_cat)


def _deform_matmul(patches_bf16, w_bf16, b_f32, tn):
    n_pad, kkc = patches_bf16.shape
    c_pad = w_bf16.shape[1]
    return pl.pallas_call(
        _deform_matmul_kernel,
        out_shape=jax.ShapeDtypeStruct((n_pad, c_pad), jnp.float32),
        grid=(n_pad // tn, c_pad // LANE),
        in_specs=[pl.BlockSpec((tn, kkc), lambda i, j: (i, 0)),
                  pl.BlockSpec((kkc, LANE), lambda i, j: (0, j)),
                  pl.BlockSpec((1, LANE), lambda i, j: (0, j))],
        out_specs=pl.BlockSpec((tn, LANE), lambda i, j: (i, j)),
        compiler_params=_COMPILER_PARAMS,
    )(patches_bf16, w_bf16, b_f32)


# ---------------------------------------------------------------------------
# Glue (im2col, coordinate math, gathers)
# ---------------------------------------------------------------------------

def _im2col(x, K, stride, pad):
    """Standard (zero-offset) im2col; column order = (c, kh, kw)."""
    B, C, H, W = x.shape
    xp = jnp.pad(x, ((0, 0), (0, 0), (pad, pad), (pad, pad)))
    Hout = (H + 2 * pad - K) // stride + 1
    Wout = (W + 2 * pad - K) // stride + 1
    cols = []
    for i in range(K):
        for j in range(K):
            cols.append(xp[:, :, i:i + stride * Hout:stride,
                           j:j + stride * Wout:stride])
    patches = jnp.stack(cols, axis=2)              # (B, C, KK, Hout, Wout)
    patches = patches.transpose(0, 3, 4, 1, 2)     # (B, Hout, Wout, C, KK)
    return patches.reshape(B * Hout * Wout, C * K * K), Hout, Wout


def deformable_conv2d(x, w_off, b_off, w_mod, b_mod, w_reg, b_reg=None,
                      kernel_size=3, stride=1, padding=1, tn_max=512):
    B, C, H, W = x.shape
    K = kernel_size
    KK = K * K
    KKC = C * KK
    C_out = w_reg.shape[0]
    # NOTE: the contraction (KKC) dimension is kept as one block; this fits
    # VMEM comfortably for realistic C_in (e.g. C_in=512, K=3 -> 4.7 MB tile).
    # TODO(synk): tile over KKC (reduction axis) for extremely large C_in.

    patches, Hout, Wout = _im2col(x, K, stride, padding)   # (N, C*KK) f32
    N = B * Hout * Wout
    tn = _pick_row_tile(N, tn_max)
    Np = _round_up(N, tn)
    patches_bf16 = _pad_rows(patches.astype(jnp.bfloat16), Np)

    # --- fused offset_conv + modulator_conv (Pallas kernel 1) ---------------
    C3 = 3 * KK
    C3p = _round_up(C3, LANE)
    w_cat = jnp.concatenate([w_off.reshape(2 * KK, KKC),
                             w_mod.reshape(KK, KKC)], axis=0).T    # (KKC, 3KK)
    b_cat = jnp.concatenate([b_off, b_mod]).reshape(1, C3)
    w_cat = _pad_cols_to(w_cat, C3p).astype(jnp.bfloat16)
    b_cat = _pad_cols_to(b_cat, C3p).astype(jnp.float32)

    offmod = _offset_mod_conv(patches_bf16, w_cat, b_cat, 2 * KK, KK, tn)[:N]
    offsets = offmod[:, :2 * KK]                # raw offsets (y, x interleaved)
    modulator = offmod[:, 2 * KK:3 * KK]        # already 2*sigmoid(.)

    # --- sampling positions (torchvision convention: channel 2k = dy, 2k+1 = dx)
    off = offsets.reshape(B, Hout, Wout, KK, 2)
    off_y, off_x = off[..., 0], off[..., 1]

    hs = jnp.arange(Hout, dtype=jnp.float32) * stride - padding
    ws = jnp.arange(Wout, dtype=jnp.float32) * stride - padding
    ki, kj = jnp.meshgrid(jnp.arange(K, dtype=jnp.float32),
                          jnp.arange(K, dtype=jnp.float32), indexing='ij')
    ki, kj = ki.reshape(KK), kj.reshape(KK)
    py = hs[None, :, None, None] + ki[None, None, None, :] + off_y  # (B,Ho,Wo,KK)
    px = ws[None, None, :, None] + kj[None, None, None, :] + off_x

    y0 = jnp.floor(py)
    x0 = jnp.floor(px)
    ly, lx = py - y0, px - x0
    y0i, x0i = y0.astype(jnp.int32), x0.astype(jnp.int32)
    y1i, x1i = y0i + 1, x0i + 1

    x_flat = x.reshape(B, C, H * W)

    # TODO(synk): the per-pixel dynamic bilinear index gather has no clean
    # Pallas/Mosaic equivalent on TPU; the gather stays in plain JAX. The f32
    # 4-corner combine + modulation below is fused by XLA with the gather
    # epilogue, so only ONE bf16 (N, C*KK) array feeds the hot Pallas matmul.
    def gather_corner(yi, xi):
        inb = ((yi >= 0) & (yi < H) & (xi >= 0) & (xi < W)).astype(jnp.float32)
        yc = jnp.clip(yi, 0, H - 1)
        xc = jnp.clip(xi, 0, W - 1)
        flat = (yc * W + xc).reshape(B, 1, -1)
        flat = jnp.broadcast_to(flat, (B, C, flat.shape[-1]))
        g = jnp.take_along_axis(x_flat, flat, axis=2)          # (B,C,Ho*Wo*KK)
        g = g.reshape(B, C, Hout, Wout, KK).transpose(0, 2, 3, 1, 4)
        return g, inb                                          # (B,Ho,Wo,C,KK), (B,Ho,Wo,KK)

    p_tl, in_tl = gather_corner(y0i, x0i)
    p_tr, in_tr = gather_corner(y0i, x1i)
    p_bl, in_bl = gather_corner(y1i, x0i)
    p_br, in_br = gather_corner(y1i, x1i)

    # Bilinear weights (pre-multiplied with modulation) stay KK-wide; they are
    # broadcast across C only inside the fused combine below.
    mod = modulator.reshape(B, Hout, Wout, KK)
    w_tl = (1.0 - ly) * (1.0 - lx) * in_tl * mod
    w_tr = (1.0 - ly) * lx * in_tr * mod
    w_bl = ly * (1.0 - lx) * in_bl * mod
    w_br = ly * lx * in_br * mod

    deform = (p_tl * w_tl[..., None, :] + p_tr * w_tr[..., None, :]
              + p_bl * w_bl[..., None, :] + p_br * w_br[..., None, :])
    deform = _pad_rows(deform.reshape(N, KKC).astype(jnp.bfloat16), Np)

    # --- regular_conv as a lane-dense Pallas matmul (kernel 2, fused bias) --
    Cp = _round_up(C_out, LANE)
    wreg = _pad_cols_to(w_reg.reshape(C_out, KKC).T, Cp).astype(jnp.bfloat16)
    if b_reg is None:
        breg = jnp.zeros((1, Cp), jnp.float32)
    else:
        breg = _pad_cols_to(b_reg.reshape(1, C_out).astype(jnp.float32), Cp)
    out = _deform_matmul(deform, wreg, breg, tn)[:N, :C_out]
    return out.reshape(B, Hout, Wout, C_out).transpose(0, 3, 1, 2)  # NCHW


# ---------------------------------------------------------------------------
# Pure-JAX reference (direct, unoptimized) for nonzero-offset validation
# ---------------------------------------------------------------------------

def _ref_deformable_conv2d(x, w_off, b_off, w_mod, b_mod, w_reg,
                           kernel_size=3, stride=1, padding=1):
    B, C, H, W = x.shape
    K = kernel_size
    C_out = w_reg.shape[0]

    def conv(w, b):
        y = lax.conv_general_dilated(
            x, w, (stride, stride), ((padding, padding), (padding, padding)),
            dimension_numbers=('NCHW', 'OIHW', 'NCHW'))
        return y + b[None, :, None, None]

    offsets = conv(w_off, b_off)                         # (B, 2KK, Ho, Wo)
    modulator = 2.0 * jax.nn.sigmoid(conv(w_mod, b_mod)) # (B, KK, Ho, Wo)
    Ho, Wo = offsets.shape[2], offsets.shape[3]

    bidx = jnp.arange(B)[:, None, None]
    hs = jnp.arange(Ho, dtype=jnp.float32) * stride - padding
    ws = jnp.arange(Wo, dtype=jnp.float32) * stride - padding

    def bilinear(py, px):
        y0 = jnp.floor(py)
        x0 = jnp.floor(px)
        ly, lx = py - y0, px - x0
        y0i, x0i = y0.astype(jnp.int32), x0.astype(jnp.int32)

        def corner(yi, xi, wgt):
            inb = ((yi >= 0) & (yi < H) & (xi >= 0) & (xi < W)).astype(jnp.float32)
            yc = jnp.clip(yi, 0, H - 1)
            xc = jnp.clip(xi, 0, W - 1)
            g = x[bidx, :, yc, xc]                       # (B, Ho, Wo, C)
            return g * (wgt * inb)[..., None]

        s = (corner(y0i, x0i, (1 - ly) * (1 - lx))
             + corner(y0i, x0i + 1, (1 - ly) * lx)
             + corner(y0i + 1, x0i, ly * (1 - lx))
             + corner(y0i + 1, x0i + 1, ly * lx))
        return s.transpose(0, 3, 1, 2)                   # (B, C, Ho, Wo)

    out = jnp.zeros((B, C_out, Ho, Wo), jnp.float32)
    for kh in range(K):
        for kw in range(K):
            k = kh * K + kw
            py = hs[None, :, None] + kh + offsets[:, 2 * k]
            px = ws[None, None, :] + kw + offsets[:, 2 * k + 1]
            sampled = bilinear(py, px) * modulator[:, k][:, None]
            out = out + jnp.einsum('bchw,oc->bohw', sampled, w_reg[:, :, kh, kw])
    return out


# ---------------------------------------------------------------------------
# Main
# ---------------------------------------------------------------------------

if __name__ == "__main__":
    B, C_in, C_out, H, W, K = 2, 4, 8, 16, 16, 3
    stride, padding = 1, 1
    KK = K * K

    key = jax.random.PRNGKey(0)
    k_x, k_w, k_wo, k_bo, k_wm, k_bm = jax.random.split(key, 6)
    x = jax.random.normal(k_x, (B, C_in, H, W), dtype=jnp.float32)

    # regular_conv: PyTorch default kaiming-uniform (bound = 1/sqrt(fan_in)), bias=False.
    fan_in = C_in * K * K
    bound = 1.0 / np.sqrt(fan_in)
    w_reg = jax.random.uniform(k_w, (C_out, C_in, K, K), jnp.float32,
                               minval=-bound, maxval=bound)

    # --- Test 1: module as initialized (zero offsets, unit modulator) -------
    # offset_conv / modulator_conv are zero-initialized in the PyTorch module,
    # so deform_conv2d reduces to a standard conv.
    w_off0 = jnp.zeros((2 * KK, C_in, K, K), jnp.float32)
    b_off0 = jnp.zeros((2 * KK,), jnp.float32)
    w_mod0 = jnp.zeros((KK, C_in, K, K), jnp.float32)
    b_mod0 = jnp.zeros((KK,), jnp.float32)
    out0 = jax.block_until_ready(
        deformable_conv2d(x, w_off0, b_off0, w_mod0, b_mod0, w_reg,
                          kernel_size=K, stride=stride, padding=padding))
    ref0 = lax.conv_general_dilated(
        x, w_reg, (stride, stride), ((padding, padding), (padding, padding)),
        dimension_numbers=('NCHW', 'OIHW', 'NCHW'))
    assert out0.shape == (B, C_out, H, W)
    assert np.allclose(np.asarray(out0), np.asarray(ref0), rtol=5e-2, atol=5e-2)

    # --- Test 2: nonzero offsets / modulation vs pure-JAX deform_conv2d -----
    w_off = 0.05 * jax.random.normal(k_wo, (2 * KK, C_in, K, K), jnp.float32)
    b_off = 0.30 * jax.random.normal(k_bo, (2 * KK,), jnp.float32)
    w_mod = 0.05 * jax.random.normal(k_wm, (KK, C_in, K, K), jnp.float32)
    b_mod = 0.30 * jax.random.normal(k_bm, (KK,), jnp.float32)
    out1 = jax.block_until_ready(
        deformable_conv2d(x, w_off, b_off, w_mod, b_mod, w_reg,
                          kernel_size=K, stride=stride, padding=padding))
    ref1 = _ref_deformable_conv2d(x, w_off, b_off, w_mod, b_mod, w_reg,
                                  kernel_size=K, stride=stride, padding=padding)
    assert np.allclose(np.asarray(out1), np.asarray(ref1), rtol=5e-2, atol=5e-2)

    print("KERNEL_OK")
</pallas_src>

<mosaic_0001>
module attributes {stable_mosaic.version = 11 : i64} {
  func.func @_offset_mod_kernel(%arg0: i32, %arg1: i32, %arg2: memref<256x36xbf16, #tpu.memory_space<vmem>>, %arg3: memref<36x128xbf16, #tpu.memory_space<vmem>>, %arg4: memref<1x128xf32, #tpu.memory_space<vmem>>, %arg5: memref<256x128xf32, #tpu.memory_space<vmem>>) attributes {dimension_semantics = [#tpu.dimension_semantics<parallel>, #tpu.dimension_semantics<parallel>], iteration_bounds = array<i64: 2, 1>, scalar_prefetch = 0 : i64, scratch_operands = 0 : i64, tpu.core_type = #tpu.core_type<tc>, window_params = [{transform_indices = @transform_0, window_bounds = array<i64: 256, 36>}, {transform_indices = @transform_1, window_bounds = array<i64: 36, 128>}, {transform_indices = @transform_2, window_bounds = array<i64: 1, 128>}, {transform_indices = @transform_3, window_bounds = array<i64: 256, 128>}]} {
    %c0 = arith.constant 0 : index
    %c0_0 = arith.constant 0 : index
    %0 = vector.load %arg2[%c0, %c0_0] : memref<256x36xbf16, #tpu.memory_space<vmem>>, vector<256x36xbf16>
    %c0_1 = arith.constant 0 : index
    %c0_2 = arith.constant 0 : index
    %1 = vector.load %arg3[%c0_1, %c0_2] : memref<36x128xbf16, #tpu.memory_space<vmem>>, vector<36x128xbf16>
    %cst = arith.constant dense<0.000000e+00> : vector<256x128xf32>
    %2 = tpu.matmul %0, %1, %cst {dimension_numbers = #tpu.dot_dimension_numbers<[1], [0], [0], [1], [0, 0, 1, 1], [], []>} : vector<256x36xbf16>, vector<36x128xbf16>, vector<256x128xf32> -> vector<256x128xf32>
    %c0_3 = arith.constant 0 : index
    %c0_4 = arith.constant 0 : index
    %3 = vector.load %arg4[%c0_3, %c0_4] : memref<1x128xf32, #tpu.memory_space<vmem>>, vector<1x128xf32>
    %4 = vector.broadcast %3 : vector<1x128xf32> to vector<256x128xf32>
    %5 = arith.addf %2, %4 : vector<256x128xf32>
    %c128_i32 = arith.constant 128 : i32
    %6 = arith.muli %arg1, %c128_i32 : i32
    %7 = tpu.iota {dimensions = array<i32: 1>} : vector<256x128xi32>
    %8 = vector.broadcast %6 : i32 to vector<256x128xi32>
    %9 = arith.addi %8, %7 : vector<256x128xi32>
    %c18_i32 = arith.constant 18 : i32
    %10 = vector.broadcast %c18_i32 : i32 to vector<256x128xi32>
    %11 = arith.cmpi sge, %9, %10 : vector<256x128xi32>
    %c27_i32 = arith.constant 27 : i32
    %12 = vector.broadcast %c27_i32 : i32 to vector<256x128xi32>
    %13 = arith.cmpi slt, %9, %12 : vector<256x128xi32>
    %14 = arith.andi %11, %13 : vector<256x128xi1>
    %15 = arith.negf %5 : vector<256x128xf32>
    %16 = math.exp %15 : vector<256x128xf32>
    %cst_5 = arith.constant 1.000000e+00 : f32
    %17 = vector.broadcast %cst_5 : f32 to vector<256x128xf32>
    %18 = arith.addf %17, %16 : vector<256x128xf32>
    %19 = arith.divf %17, %18 : vector<256x128xf32>
    %cst_6 = arith.constant 2.000000e+00 : f32
    %20 = vector.broadcast %cst_6 : f32 to vector<256x128xf32>
    %21 = arith.mulf %20, %19 : vector<256x128xf32>
    %22 = arith.select %14, %21, %5 : vector<256x128xi1>, vector<256x128xf32>
    %c0_7 = arith.constant 0 : index
    %c0_8 = arith.constant 0 : index
    %23 = vector.load %arg5[%c0_7, %c0_8] : memref<256x128xf32, #tpu.memory_space<vmem>>, vector<256x128xf32>
    tpu.vector_store %arg5[%c0_7, %c0_8], %22 {strides = array<i32>} : memref<256x128xf32, #tpu.memory_space<vmem>>, vector<256x128xf32>,
    return
  }
  func.func @transform_0(%arg0: i32, %arg1: i32) -> (i32, i32) {
    %c0_i32 = arith.constant 0 : i32
    %c0_i32_0 = arith.constant 0 : i32
    return %arg0, %c0_i32 : i32, i32
  }
  func.func @transform_1(%arg0: i32, %arg1: i32) -> (i32, i32) {
    %c0_i32 = arith.constant 0 : i32
    %c0_i32_0 = arith.constant 0 : i32
    return %c0_i32, %arg1 : i32, i32
  }
  func.func @transform_2(%arg0: i32, %arg1: i32) -> (i32, i32) {
    %c0_i32 = arith.constant 0 : i32
    %c0_i32_0 = arith.constant 0 : i32
    return %c0_i32, %arg1 : i32, i32
  }
  func.func @transform_3(%arg0: i32, %arg1: i32) -> (i32, i32) {
    %c0_i32 = arith.constant 0 : i32
    return %arg0, %arg1 : i32, i32
  }
}

</mosaic_0001>

<bundles_post_ra>
// kernel: tpu_custom_call.1
= control target key start
LH: loop header
LB: loop body
LE: loop exit
PB: predicated region body
PF: predicated region fallthrough
CT: control target
= control target key end

     0   :  { %8 = vsyncpa [#allocation3], 0  ;;  %s1868_s0 = inlined_call_operand.vmem [shape: bf16[512,36], index: 0, kind: input, shape index: {}]   ;;  %s1869_s1 = inlined_call_operand.vmem [shape: bf16[36,128], index: 1, kind: input, shape index: {}]   ;;  %s1870_s2 = inlined_call_operand.vmem [shape: f32[1,128], index: 2, kind: input, shape index: {}]   ;;  %s1871_s3 = inlined_call_operand.hbm [shape: f32[512,128], index: 3, kind: output, shape index: {}]  }
   0x1   :  { %10 = vsyncpa [#allocation3 + $0x1], 0  ;;  %s1435_s12 = smov 0   ;;  %s1437_s13 = smov 0  }
   0x2   :  { %s1439_s14 = smov 0   ;;  %s1441_s15 = smov 0  }
   0x3   :  { %s1443_s16 = smov 0   ;;  %s1445_s17 = smov 0  }
   0x4 LB: > { %s981_s18 = sadd.s32 4294967295, %s1410_s17   ;;  %s982_s19 = sadd.s32 4294967294, %s1410_s17   ;;  %s1410_s17 = sphi %s1445_s17, %s16_s17   ;;  %s1406_s16 = sphi %s1443_s16, %s1880_s16   ;;  %s1402_s15 = sphi %s1441_s15, %s1879_s15   ;;  %s1398_s14 = sphi %s1439_s14, %s1878_s14   ;;  %s1394_s13 = sphi %s1437_s13, %s1877_s13   ;;  %s1390_s12 = sphi %s1435_s12, %s1876_s12  }
   0x5   : > { %s28_s20 = sadd.s32 1, %s1406_s16  ;;  %s115_s21 = sadd.s32 1, %s1398_s14 }
   0x6   : > { %p30_p0 = scmp.ge.s32.totalorder %s28_s20, 2  ;;  %p125_p1 = scmp.ne.s32.totalorder %s1398_s14, %s1394_s13 }
   0x7   : > { %p126_p2 = scmp.eq.s32.totalorder %s981_s18, 1  ;;  %p131_p3 = scmp.ne.s32.totalorder %s1394_s13, %s1390_s12 }
   0x8   : > { %s1882_s20 = smov (%p30_p0, %s28_s20), 0  ;;  %p132_p5 = scmp.eq.s32.totalorder %s982_s19, 1 }
   0x9   : > { %p1475_p4 = por %p126_p2, %p125_p1  ;;  %s110_s23 = ssub.s32 %s1406_s16, %s1882_s20 }
   0xa   : > { %p987_p6 = scmp.ge.s32.totalorder %s1410_s17, 1  ;;  %p113_p7 = scmp.eq.s32.totalorder %s110_s23, 0 }
   0xb   : > { %p1482_p8 = por %p132_p5, %p131_p3  ;;  %p172_p9 = scmp.lt.s32.totalorder %s1410_s17, 3 }
   0xc   : > { %s1488_s25 = scalar_select %p113_p7, %s1398_s14, %s115_s21  }
   0xd   : > { %p173_p10 = pnand %p987_p6, %p172_p9 }
   0xe   : > { %s989_s30 = sshll.u32 (!%p173_p10), %s1402_s15, 5  ;;  %s200_s18 = sand.u32 (!%p173_p10), 1, %s1394_s13  }
   0xf   : > { %176 = sbr.rel (%p173_p10) target bundleno = 324 (0x144), region = 32  ;;  %p204_p11 = scmp.lt.s32.totalorder (!%p173_p10), %s989_s30, 63 }
  0x10   : > { %s1633_s19 = sshll.u32 (!%p173_p10), %s200_s18, 8  ;;  %s1064_s23 = sshll.u32 (!%p173_p10), %s1402_s15, 12 }
  0x11   : > { %s1666_s21 = scalar_lea.vmem (!%p173_p10), [#allocation2], %s1633_s19  ;;  %s1808_s28 = scalar_lea.hbm (!%p173_p10), %s1871_s3, %s1064_s23 }
  0x12   : > { %s882_s26 = sshll.u32 (!%p173_p10), %s1666_s21, 4  ;;  %s1823_s29 = scalar_lea.sflag (!%p173_p10), [#allocation3], %s200_s18  ;;  %s1810_s26 = int_to_ptr.vmem [resolvable:$true] %s882_s26 }
  0x13   : > { %s1412_s4 = smov (!%p173_p10), [#allocation2]  }
  0x14   : > { %v1187_v0 = vld [vmem:[%s1869_s1 + $0x10] ss:$0 sps:$4 sm:$0x33]   ;;  %vm406_vm0 = vcmask 1041408   ;;  %v1188_v1 = vld [vmem:[%s1869_s1 + $0x8] sm:$0xff]   ;;  %v1189_v3 = vld [vmem:[%s1869_s1] sm:$0xff]  }
  0x15   : > { %1128 = vmatprep.subr.msk.bf16.mxu0 %vm406_vm0, %v1187_v0  ;;  %1129 = vmatprep.subr.msk.bf16.mxu1 %vm406_vm0, %v1187_v0  ;;  %v408_v2 = vsel %vm406_vm0, %v1187_v0, 0  ;;  %s1884_s30 = smov (!%p204_p11, %s989_s30), 63  ;;  %vm357_vm1 = vcmask 293888   ;;  %v1540_v20 = vld [vmem:[%s1870_s2] ss:$0 sm:$0xff]  ;;  %s1338_s5 = sshll.u32 %s1412_s4, 4  ;;  %s1339_s5 = int_to_ptr.vmem [resolvable:$false] %s1338_s5 }
  0x16   : > { %1085 = vmatpush3.bf16.msra.mxu0 %v408_v2  ;;  %1125 = vmatpush3.bf16.msra.mxu1 %v408_v2  ;;  %s990_s6 = sshll.u32 %s1884_s30, 2  ;;  %s1334_s30 = scalar_lea.vmem %s1810_s26, 4096 }
  0x17   : > { %1086 = vmatprep.subr.bf16.mxu0 %v1188_v1  ;;  %1123 = vmatprep.subr.bf16.mxu1 %v1188_v1  ;;  %s1503_s9 = scalar_lea.vmem %s1868_s0, %s990_s6  ;;  %p1335_p12 = scmp.ne.s32.totalorder %s1810_s26, %s1334_s30 }
  0x18   : > { %v1190_v4 = vld [vmem:[%s1503_s9] sm:$0xff]   ;;  %v1192_v6 = vld [vmem:[%s1503_s9 + $0x8] sm:$0xff]   ;;  %v1194_v8 = vld [vmem:[%s1503_s9 + $0x10] sm:$0xff]   ;;  %s1340_s6 = scalar_lea.vmem %s1339_s5, 8192  ;;  %p1341_p1 = scmp.lt.s32.totalorder %s1810_s26, %s1339_s5 }
  0x19   : > { %v1191_v5 = vld [vmem:[%s1503_s9 + $0x40] sm:$0xff]   ;;  %1090 = vmatprep.mubr.msk.bf16.mxu0 %vm357_vm1, %v1190_v4  ;;  %v1193_v7 = vld [vmem:[%s1503_s9 + $0x48] sm:$0xff]   ;;  %v1195_v9 = vld [vmem:[%s1503_s9 + $0x50] sm:$0xff]   ;;  %p1336_p13 = pnand %p1335_p12, %p1475_p4  ;;  %p1342_p2 = scmp.lt.s32.totalorder %s1340_s6, %s1334_s30 }
  0x1a   : > { %1087 = vmatpush3.bf16.msra.mxu0 %v1188_v1  ;;  %1126 = vmatpush3.bf16.msra.mxu1 %v1188_v1  ;;  %v1196_v10 = vld [vmem:[%s1503_s9 + $0x18] sm:$0xff]   ;;  %v1198_v12 = vld [vmem:[%s1503_s9 + $0x20] sm:$0xff]   ;;  %v1200_v14 = vld [vmem:[%s1503_s9 + $0x28] sm:$0xff]  }
  0x1b   : > { %1088 = vmatprep.subr.bf16.mxu0 %v1189_v3  ;;  %1124 = vmatprep.subr.bf16.mxu1 %v1189_v3  ;;  %v1197_v11 = vld [vmem:[%s1503_s9 + $0x58] sm:$0xff]   ;;  %v1199_v13 = vld [vmem:[%s1503_s9 + $0x60] sm:$0xff]   ;;  %v1201_v15 = vld [vmem:[%s1503_s9 + $0x68] sm:$0xff]   ;;  %p1337_p0 = pneg %p1336_p13  ;;  %p1343_p3 = por %p1342_p2, %p1341_p1 }
  0x1c   : > { %1106 = vmatprep.mubr.msk.bf16.mxu1 %vm357_vm1, %v1191_v5  ;;  %v1202_v16 = vld [vmem:[%s1503_s9 + $0x30] sm:$0xff]   ;;  %v1204_v18 = vld [vmem:[%s1503_s9 + $0x38] sm:$0xff]  }
  0x1d   : > { %v1203_v17 = vld [vmem:[%s1503_s9 + $0x70] sm:$0xff]   ;;  %v1205_v19 = vld [vmem:[%s1503_s9 + $0x78] sm:$0xff]   ;;  %p1344_p5 = pnand %p1343_p3, %p1337_p0 }
  0x1e   : > { %1089 = vmatpush3.bf16.msra.mxu0 %v1189_v3  ;;  %1127 = vmatpush3.bf16.msra.mxu1 %v1189_v3 }
  0x21   : > { %1091 = vmatmul.mubr.msk.bf16.vlgmr.msra.gmra.mxu0 %vm357_vm1, %v1192_v6  ;;  %1107 = vmatmul.mubr.msk.bf16.vlgmr.msra.gmra.mxu1 %vm357_vm1, %v1193_v7 }
  0x22   : > { %1094 = vmatprep.mubr.msk.bf16.mxu0 %vm357_vm1, %v1194_v8  ;;  %1110 = vmatprep.mubr.msk.bf16.mxu1 %vm357_vm1, %v1195_v9 }
  0x29   : > { %1095 = vmatmul.mubr.msk.bf16.gmra.mxu0 %vm357_vm1, %v1196_v10  ;;  %1111 = vmatmul.mubr.msk.bf16.gmra.mxu1 %vm357_vm1, %v1197_v11  ;;  %v572_v11 = vlaneseq }
  0x2a   : > { %1098 = vmatprep.mubr.msk.bf16.mxu0 %vm357_vm1, %v1198_v12  ;;  %1114 = vmatprep.mubr.msk.bf16.mxu1 %vm357_vm1, %v1199_v13 }
  0x31   : > { %1099 = vmatmul.mubr.msk.bf16.gmra.mxu0 %vm357_vm1, %v1200_v14  ;;  %1115 = vmatmul.mubr.msk.bf16.gmra.mxu1 %vm357_vm1, %v1201_v15 }
  0x32   : > { %1102 = vmatprep.mubr.msk.bf16.mxu0 %vm357_vm1, %v1202_v16  ;;  %1118 = vmatprep.mubr.msk.bf16.mxu1 %vm357_vm1, %v1203_v17 }
  0x39   : > { %1103 = vmatmul.mubr.msk.bf16.gmra.mxu0 %vm357_vm1, %v1204_v18  ;;  %1119 = vmatmul.mubr.msk.bf16.gmra.mxu1 %vm357_vm1, %v1205_v19 }
  0xe1   : > { %v1092_v21 = vpop.f32.mrf.mxu0  ;;  %v1108_v22 = vpop.f32.mrf.mxu1 }
  0xe2   : > { %v1543_v23 = vadd.f32 %v1092_v21, %v1540_v20  ;;  %v1546_v24 = vadd.f32 %v1108_v22, %v1540_v20 }
  0xe3   : > { %v444_v25 = vpop.f32.mrf.mxu0  ;;  %v508_v26 = vpop.f32.mrf.mxu1 }
  0xe4   : > { %v1029_v27 = vmul.f32 -1.442695, %v1543_v23  ;;  %v1045_v28 = vmul.f32 -1.442695, %v1546_v24  ;;  %v1551_v29 = vadd.f32 %v1540_v20, %v444_v25  ;;  %v1554_v30 = vadd.f32 %v1540_v20, %v508_v26 }
  0xe5   : > { %v1093_v31 = vpop.f32.mrf.mxu0  ;;  %v1109_v32 = vpop.f32.mrf.mxu1  ;;  %v573_v25 = vand.u32 127, %v572_v11 }
  0xe6   : > { %1206 = vpow2.f32 %v1029_v27  ;;  %v1027_v33 = vmul.f32 -1.442695, %v1551_v29  ;;  %v1043_v34 = vmul.f32 -1.442695, %v1554_v30  ;;  %v1559_v35 = vadd.f32 %v1093_v31, %v1540_v20 }
  0xe7   : > { %1208 = vpow2.f32 %v1045_v28  ;;  %v1562_v36 = vadd.f32 %v1109_v32, %v1540_v20  ;;  %v447_v37 = vpop.f32.mrf.mxu0  ;;  %v511_v38 = vpop.f32.mrf.mxu1  ;;  %vm576_vm2 = vcmp.ge.s32.totalorder %v573_v25, 18  ;;  %vm577_vm3 = vcmp.lt.s32.totalorder %v573_v25, 27 }
  0xe8   : > { %1210 = vpow2.f32 %v1027_v33  ;;  %v1030_v39 = vmul.f32 -1.442695, %v1559_v35  ;;  %v1566_v40 = vadd.f32 %v1540_v20, %v447_v37  ;;  %v1569_v41 = vadd.f32 %v1540_v20, %v511_v38  ;;  %vm1645_vm4 = vmand %vm576_vm2, %vm577_vm3 }
  0xe9   : > { %1212 = vpow2.f32 %v1043_v34  ;;  %v1046_v42 = vmul.f32 -1.442695, %v1562_v36  ;;  %v1096_v43 = vpop.f32.mrf.mxu0  ;;  %v1112_v44 = vpop.f32.mrf.mxu1 }
  0xea   : > { %1214 = vpow2.f32 %v1030_v39  ;;  %v1028_v45 = vmul.f32 -1.442695, %v1566_v40  ;;  %v1044_v46 = vmul.f32 -1.442695, %v1569_v41  ;;  %v1575_v47 = vadd.f32 %v1096_v43, %v1540_v20 }
  0xeb   : > { %1216 = vpow2.f32 %v1046_v42  ;;  %v1578_v48 = vadd.f32 %v1112_v44, %v1540_v20  ;;  %v460_v49 = vpop.f32.mrf.mxu0  ;;  %v524_v50 = vpop.f32.mrf.mxu1 }
  0xec   : > { %1218 = vpow2.f32 %v1028_v45  ;;  %v1033_v51 = vmul.f32 -1.442695, %v1575_v47  ;;  %v1582_v52 = vadd.f32 %v1540_v20, %v460_v49  ;;  %v1585_v53 = vadd.f32 %v1540_v20, %v524_v50 }
  0xed   : > { %1220 = vpow2.f32 %v1044_v46  ;;  %v1049_v54 = vmul.f32 -1.442695, %v1578_v48  ;;  %v1097_v55 = vpop.f32.mrf.mxu0  ;;  %v1113_v56 = vpop.f32.mrf.mxu1 }
  0xee   : > { %1222 = vpow2.f32 %v1033_v51  ;;  %v1031_v57 = vmul.f32 -1.442695, %v1582_v52  ;;  %v1047_v58 = vmul.f32 -1.442695, %v1585_v53  ;;  %v1591_v59 = vadd.f32 %v1097_v55, %v1540_v20 }
  0xef   : > { %1224 = vpow2.f32 %v1049_v54  ;;  %v1594_v60 = vadd.f32 %v1113_v56, %v1540_v20  ;;  %v463_v61 = vpop.f32.mrf.mxu0  ;;  %v527_v62 = vpop.f32.mrf.mxu1 }
  0xf0   : > { %1226 = vpow2.f32 %v1031_v57  ;;  %v1034_v63 = vmul.f32 -1.442695, %v1591_v59  ;;  %v1598_v0 = vadd.f32 %v1540_v20, %v463_v61  ;;  %v1601_v1 = vadd.f32 %v1540_v20, %v527_v62 }
  0xf1   : > { %1228 = vpow2.f32 %v1047_v58  ;;  %v1050_v2 = vmul.f32 -1.442695, %v1594_v60  ;;  %v1100_v3 = vpop.f32.mrf.mxu0  ;;  %v1116_v4 = vpop.f32.mrf.mxu1 }
  0xf2   : > { %1230 = vpow2.f32 %v1034_v63  ;;  %v1032_v5 = vmul.f32 -1.442695, %v1598_v0  ;;  %v1048_v6 = vmul.f32 -1.442695, %v1601_v1  ;;  %v1607_v31 = vadd.f32 %v1100_v3, %v1540_v20 }
  0xf3   : > { %v1207_v7 = vpop.eup %1206  ;;  %1232 = vpow2.f32 %v1050_v2  ;;  %v476_v8 = vpop.f32.mrf.mxu0  ;;  %v1610_v42 = vadd.f32 %v1116_v4, %v1540_v20 }
  0xf4   : > { %v540_v9 = vpop.f32.mrf.mxu1  ;;  %v1209_v10 = vpop.eup %1208  ;;  %v677_v12 = vadd.f32 1.0, %v1207_v7  ;;  %1234 = vpow2.f32 %v1032_v5  ;;  %v1613_v45 = vadd.f32 %v1540_v20, %v476_v8  ;;  %v1037_v50 = vmul.f32 -1.442695, %v1607_v31 }
  0xf5   : > { %v1211_v13 = vpop.eup %1210  ;;  %v693_v14 = vadd.f32 1.0, %v1209_v10  ;;  %1236 = vpow2.f32 %v1048_v6  ;;  %v1101_v15 = vpop.f32.mrf.mxu0  ;;  %v1618_v56 = vadd.f32 %v1540_v20, %v540_v9  ;;  %v1053_v63 = vmul.f32 -1.442695, %v1610_v42 }
  0xf6   : > { %v1213_v16 = vpop.eup %1212  ;;  %1238 = vrcp.f32 %v677_v12  ;;  %v675_v17 = vadd.f32 1.0, %v1211_v13  ;;  %v1117_v18 = vpop.f32.mrf.mxu1  ;;  %v1621_v57 = vadd.f32 %v1101_v15, %v1540_v20  ;;  %v1035_v5 = vmul.f32 -1.442695, %v1613_v45 }
  0xf7   : > { %v1215_v19 = vpop.eup %1214  ;;  %1240 = vrcp.f32 %v693_v14  ;;  %v691_v21 = vadd.f32 1.0, %v1213_v16  ;;  %v479_v32 = vpop.f32.mrf.mxu0  ;;  %v1625_v2 = vadd.f32 %v1117_v18, %v1540_v20  ;;  %v1051_v14 = vmul.f32 -1.442695, %v1618_v56 }
  0xf8   : > { %v1217_v22 = vpop.eup %1216  ;;  %1242 = vrcp.f32 %v675_v17  ;;  %v678_v26 = vadd.f32 1.0, %v1215_v19  ;;  %v543_v37 = vpop.f32.mrf.mxu1  ;;  %v1629_v6 = vadd.f32 %v1540_v20, %v479_v32  ;;  %v1038_v15 = vmul.f32 -1.442695, %v1621_v57 }
  0xf9   : > { %v1219_v27 = vpop.eup %1218  ;;  %1244 = vrcp.f32 %v691_v21  ;;  %v694_v28 = vadd.f32 1.0, %v1217_v22  ;;  %v1104_v51 = vpop.f32.mrf.mxu0  ;;  %v1636_v9 = vadd.f32 %v1540_v20, %v543_v37  ;;  %v1054_v21 = vmul.f32 -1.442695, %v1625_v2 }
  0xfa   : > { %v1221_v33 = vpop.eup %1220  ;;  %1246 = vrcp.f32 %v678_v26  ;;  %v676_v34 = vadd.f32 1.0, %v1219_v27  ;;  %v1120_v58 = vpop.f32.mrf.mxu1  ;;  %v1639_v10 = vadd.f32 %v1104_v51, %v1540_v20 }
  0xfb   : > { %v1223_v38 = vpop.eup %1222  ;;  %1248 = vrcp.f32 %v694_v28  ;;  %v692_v39 = vadd.f32 1.0, %v1221_v33  ;;  %v492_v11 = vpop.f32.mrf.mxu0  ;;  %v1651_v22 = vadd.f32 %v1120_v58, %v1540_v20  ;;  %v1036_v28 = vmul.f32 -1.442695, %v1629_v6 }
  0xfc   : > { %v1225_v43 = vpop.eup %1224  ;;  %1250 = vrcp.f32 %v676_v34  ;;  %v681_v44 = vadd.f32 1.0, %v1223_v38  ;;  %v556_v16 = vpop.f32.mrf.mxu1  ;;  %v1655_v32 = vadd.f32 %v1540_v20, %v492_v11  ;;  %v1052_v34 = vmul.f32 -1.442695, %v1636_v9 }
  0xfd   : > { %v1227_v46 = vpop.eup %1226  ;;  %1252 = vrcp.f32 %v692_v39  ;;  %v697_v49 = vadd.f32 1.0, %v1225_v43  ;;  %v1041_v37 = vmul.f32 -1.442695, %v1639_v10  ;;  %v1105_v38 = vpop.f32.mrf.mxu0 }
  0xfe   : > { %v1229_v54 = vpop.eup %1228  ;;  %1254 = vrcp.f32 %v681_v44  ;;  %v679_v55 = vadd.f32 1.0, %v1227_v46  ;;  %v1663_v46 = vadd.f32 %v1540_v20, %v556_v16 }
  0xff   : > { %v1231_v61 = vpop.eup %1230  ;;  %1256 = vrcp.f32 %v697_v49  ;;  %v695_v62 = vadd.f32 1.0, %v1229_v54  ;;  %v1121_v49 = vpop.f32.mrf.mxu1 }
 0x100   : > { %v1233_v3 = vpop.eup %1232  ;;  %1258 = vrcp.f32 %v679_v55  ;;  %v682_v4 = vadd.f32 1.0, %v1231_v61  ;;  %v1055_v11 = vmul.f32 -1.442695, %v1663_v46  ;;  %v1695_v16 = vadd.f32 %v1121_v49, %v1540_v20 }
 0x101   : > { %v1235_v7 = vpop.eup %1234  ;;  %1260 = vrcp.f32 %v695_v62  ;;  %v698_v8 = vadd.f32 1.0, %v1233_v3  ;;  %v1039_v62 = vmul.f32 -1.442695, %v1655_v32 }
 0x102   : > { %v1237_v12 = vpop.eup %1236  ;;  %1262 = vrcp.f32 %v682_v4  ;;  %v680_v13 = vadd.f32 1.0, %v1235_v7  ;;  %v1683_v4 = vadd.f32 %v1105_v38, %v1540_v20  ;;  %v495_v7 = vpop.f32.mrf.mxu0 }
 0x103   : > { %v1239_v17 = vpop.eup %1238  ;;  %1264 = vrcp.f32 %v698_v8  ;;  %v696_v19 = vadd.f32 1.0, %v1237_v12  ;;  %v559_v12 = vpop.f32.mrf.mxu1 }
 0x104   : > { %v1241_v26 = vpop.eup %1240  ;;  %v773_v27 = vmul.f32 2.0, %v1239_v17  ;;  %1266 = vrcp.f32 %v680_v13 }
 0x105   : > { %v1243_v25 = vpop.eup %1242  ;;  %v789_v33 = vmul.f32 2.0, %v1241_v26  ;;  %1268 = vrcp.f32 %v696_v19  ;;  %v1702_v19 = vadd.f32 %v1540_v20, %v495_v7 }
 0x106   : > { %v1245_v39 = vpop.eup %1244  ;;  %v805_v43 = vsel %vm1645_vm4, %v773_v27, %v1543_v23  ;;  %v771_v44 = vmul.f32 2.0, %v1243_v25  ;;  %1270 = vpow2.f32 %v1037_v50  ;;  %v1057_v23 = vmul.f32 -1.442695, %v1651_v22 }
 0x107   : > { %v1247_v51 = vpop.eup %1246  ;;  %837 = vst [vmem:[%s1666_s21 + $0x10] sm:$0xff] %v805_v43  ;;  %v821_v54 = vsel %vm1645_vm4, %v789_v33, %v1546_v24  ;;  %v787_v55 = vmul.f32 2.0, %v1245_v39  ;;  %1272 = vpow2.f32 %v1053_v63  ;;  %v1709_v27 = vadd.f32 %v1540_v20, %v559_v12 }
 0x108   : > { %v1249_v50 = vpop.eup %1248  ;;  %853 = vst [vmem:[%s1666_s21 + $0x90] sm:$0xff] %v821_v54  ;;  %v803_v58 = vsel %vm1645_vm4, %v771_v44, %v1551_v29  ;;  %v774_v61 = vmul.f32 2.0, %v1247_v51  ;;  %1274 = vpow2.f32 %v1035_v5  ;;  %v1042_v33 = vmul.f32 -1.442695, %v1683_v4 }
 0x109   : > { %v1251_v3 = vpop.eup %1250  ;;  %835 = vst [vmem:[%s1666_s21] sm:$0xff] %v803_v58  ;;  %v819_v24 = vsel %vm1645_vm4, %v787_v55, %v1554_v30  ;;  %v790_v63 = vmul.f32 2.0, %v1249_v50  ;;  %1276 = vpow2.f32 %v1051_v14  ;;  %v1058_v20 = vmul.f32 -1.442695, %v1695_v16 }
 0x10a   : > { %v1253_v8 = vpop.eup %1252  ;;  %851 = vst [vmem:[%s1666_s21 + $0x80] sm:$0xff] %v819_v24  ;;  %v806_v29 = vsel %vm1645_vm4, %v774_v61, %v1559_v35  ;;  %v772_v5 = vmul.f32 2.0, %v1251_v3  ;;  %1278 = vpow2.f32 %v1038_v15  ;;  %v1040_v43 = vmul.f32 -1.442695, %v1702_v19 }
 0x10b   : > { %v1255_v30 = vpop.eup %1254  ;;  %838 = vst [vmem:[%s1666_s21 + $0x18] sm:$0xff] %v806_v29  ;;  %v822_v13 = vsel %vm1645_vm4, %v790_v63, %v1562_v36  ;;  %v788_v14 = vmul.f32 2.0, %v1253_v8  ;;  %1280 = vpow2.f32 %v1054_v21  ;;  %v1056_v51 = vmul.f32 -1.442695, %v1709_v27 }
 0x10c   : > { %v1257_v17 = vpop.eup %1256  ;;  %854 = vst [vmem:[%s1666_s21 + $0x98] sm:$0xff] %v822_v13  ;;  %v804_v35 = vsel %vm1645_vm4, %v772_v5, %v1566_v40  ;;  %v777_v15 = vmul.f32 2.0, %v1255_v30  ;;  %1282 = vpow2.f32 %v1036_v28 }
 0x10d   : > { %v1259_v26 = vpop.eup %1258  ;;  %836 = vst [vmem:[%s1666_s21 + $0x8] sm:$0xff] %v804_v35  ;;  %v820_v36 = vsel %vm1645_vm4, %v788_v14, %v1569_v41  ;;  %v793_v21 = vmul.f32 2.0, %v1257_v17  ;;  %1284 = vpow2.f32 %v1052_v34 }
 0x10e   : > { %v1261_v25 = vpop.eup %1260  ;;  %852 = vst [vmem:[%s1666_s21 + $0x88] sm:$0xff] %v820_v36  ;;  %v809_v40 = vsel %vm1645_vm4, %v777_v15, %v1575_v47  ;;  %v775_v28 = vmul.f32 2.0, %v1259_v26  ;;  %1286 = vpow2.f32 %v1041_v37 }
 0x10f   : > { %v1263_v38 = vpop.eup %1262  ;;  %841 = vst [vmem:[%s1666_s21 + $0x30] sm:$0xff] %v809_v40  ;;  %v825_v41 = vsel %vm1645_vm4, %v793_v21, %v1578_v48  ;;  %v791_v34 = vmul.f32 2.0, %v1261_v25  ;;  %1288 = vpow2.f32 %v1057_v23 }
 0x110   : > { %v1265_v39 = vpop.eup %1264  ;;  %857 = vst [vmem:[%s1666_s21 + $0xb0] sm:$0xff] %v825_v41  ;;  %v807_v47 = vsel %vm1645_vm4, %v775_v28, %v1582_v52  ;;  %v778_v37 = vmul.f32 2.0, %v1263_v38  ;;  %1290 = vpow2.f32 %v1039_v62 }
 0x111   : > { %v1267_v44 = vpop.eup %1266  ;;  %839 = vst [vmem:[%s1666_s21 + $0x20] sm:$0xff] %v807_v47  ;;  %v823_v48 = vsel %vm1645_vm4, %v791_v34, %v1585_v53  ;;  %v794_v49 = vmul.f32 2.0, %v1265_v39  ;;  %1292 = vpow2.f32 %v1055_v11 }
 0x112   : > { %v1269_v54 = vpop.eup %1268  ;;  %855 = vst [vmem:[%s1666_s21 + $0xa0] sm:$0xff] %v823_v48  ;;  %v810_v52 = vsel %vm1645_vm4, %v778_v37, %v1591_v59  ;;  %v776_v55 = vmul.f32 2.0, %v1267_v44  ;;  %1294 = vpow2.f32 %v1042_v33 }
 0x113   : > { %v1271_v23 = vpop.eup %1270  ;;  %842 = vst [vmem:[%s1666_s21 + $0x38] sm:$0xff] %v810_v52  ;;  %v826_v53 = vsel %vm1645_vm4, %v794_v49, %v1594_v60  ;;  %v792_v50 = vmul.f32 2.0, %v1269_v54  ;;  %1296 = vpow2.f32 %v1058_v20 }
 0x114   : > { %v1273_v58 = vpop.eup %1272  ;;  %858 = vst [vmem:[%s1666_s21 + $0xb8] sm:$0xff] %v826_v53  ;;  %v808_v61 = vsel %vm1645_vm4, %v776_v55, %v1598_v0  ;;  %v685_v62 = vadd.f32 1.0, %v1271_v23  ;;  %1298 = vpow2.f32 %v1040_v43 }
 0x115   : > { %v1275_v59 = vpop.eup %1274  ;;  %840 = vst [vmem:[%s1666_s21 + $0x28] sm:$0xff] %v808_v61  ;;  %v824_v3 = vsel %vm1645_vm4, %v792_v50, %v1601_v1  ;;  %v701_v24 = vadd.f32 1.0, %v1273_v58  ;;  %1300 = vpow2.f32 %v1056_v51 }
 0x116   : > { %v1277_v63 = vpop.eup %1276  ;;  %856 = vst [vmem:[%s1666_s21 + $0xa8] sm:$0xff] %v824_v3  ;;  %1302 = vrcp.f32 %v685_v62  ;;  %v683_v60 = vadd.f32 1.0, %v1275_v59 }
 0x117   : > { %v1279_v7 = vpop.eup %1278  ;;  %1304 = vrcp.f32 %v701_v24  ;;  %v699_v8 = vadd.f32 1.0, %v1277_v63 }
 0x118   : > { %v1281_v29 = vpop.eup %1280  ;;  %1306 = vrcp.f32 %v683_v60  ;;  %v686_v0 = vadd.f32 1.0, %v1279_v7 }
 0x119   : > { %v1283_v5 = vpop.eup %1282  ;;  %1308 = vrcp.f32 %v699_v8  ;;  %v702_v11 = vadd.f32 1.0, %v1281_v29 }
 0x11a   : > { %v1285_v12 = vpop.eup %1284  ;;  %1310 = vrcp.f32 %v686_v0  ;;  %v684_v30 = vadd.f32 1.0, %v1283_v5 }
 0x11b   : > { %v1287_v13 = vpop.eup %1286  ;;  %1312 = vrcp.f32 %v702_v11  ;;  %v700_v1 = vadd.f32 1.0, %v1285_v12 }
 0x11c   : > { %v1289_v14 = vpop.eup %1288  ;;  %1314 = vrcp.f32 %v684_v30  ;;  %v689_v17 = vadd.f32 1.0, %v1287_v13 }
 0x11d   : > { %v1291_v35 = vpop.eup %1290  ;;  %1316 = vrcp.f32 %v700_v1  ;;  %v705_v15 = vadd.f32 1.0, %v1289_v14 }
 0x11e   : > { %v1293_v26 = vpop.eup %1292  ;;  %1318 = vrcp.f32 %v689_v17  ;;  %v687_v36 = vadd.f32 1.0, %v1291_v35 }
 0x11f   : > { %v1295_v21 = vpop.eup %1294  ;;  %1320 = vrcp.f32 %v705_v15  ;;  %v703_v25 = vadd.f32 1.0, %v1293_v26 }
 0x120   : > { %v1297_v40 = vpop.eup %1296  ;;  %1322 = vrcp.f32 %v687_v36  ;;  %v690_v28 = vadd.f32 1.0, %v1295_v21 }
 0x121   : > { %v1299_v33 = vpop.eup %1298  ;;  %1324 = vrcp.f32 %v703_v25  ;;  %v706_v38 = vadd.f32 1.0, %v1297_v40 }
 0x122   : > { %v1301_v41 = vpop.eup %1300  ;;  %1326 = vrcp.f32 %v690_v28  ;;  %v688_v34 = vadd.f32 1.0, %v1299_v33 }
 0x123   : > { %v1303_v20 = vpop.eup %1302  ;;  %1328 = vrcp.f32 %v706_v38  ;;  %v704_v39 = vadd.f32 1.0, %v1301_v41 }
 0x124   : > { %v1305_v47 = vpop.eup %1304  ;;  %v781_v37 = vmul.f32 2.0, %v1303_v20  ;;  %1330 = vrcp.f32 %v688_v34 }
 0x125   : > { %v1307_v43 = vpop.eup %1306  ;;  %v797_v44 = vmul.f32 2.0, %v1305_v47  ;;  %1332 = vrcp.f32 %v704_v39 }
 0x126   : > { %v1309_v48 = vpop.eup %1308  ;;  %v813_v49 = vsel %vm1645_vm4, %v781_v37, %v1607_v31  ;;  %v779_v51 = vmul.f32 2.0, %v1307_v43 }
 0x127   : > { %v1311_v54 = vpop.eup %1310  ;;  %845 = vst [vmem:[%s1666_s21 + $0x50] sm:$0xff] %v813_v49  ;;  %v829_v52 = vsel %vm1645_vm4, %v797_v44, %v1610_v42  ;;  %v795_v55 = vmul.f32 2.0, %v1309_v48 }
 0x128   : > { %v1313_v23 = vpop.eup %1312  ;;  %861 = vst [vmem:[%s1666_s21 + $0xd0] sm:$0xff] %v829_v52  ;;  %v811_v53 = vsel %vm1645_vm4, %v779_v51, %v1613_v45  ;;  %v782_v50 = vmul.f32 2.0, %v1311_v54 }
 0x129   : > { %v1315_v58 = vpop.eup %1314  ;;  %843 = vst [vmem:[%s1666_s21 + $0x40] sm:$0xff] %v811_v53  ;;  %v827_v31 = vsel %vm1645_vm4, %v795_v55, %v1618_v56  ;;  %v798_v61 = vmul.f32 2.0, %v1313_v23 }
 0x12a   : > { %v1317_v62 = vpop.eup %1316  ;;  %859 = vst [vmem:[%s1666_s21 + $0xc0] sm:$0xff] %v827_v31  ;;  %v814_v42 = vsel %vm1645_vm4, %v782_v50, %v1621_v57  ;;  %v780_v59 = vmul.f32 2.0, %v1315_v58 }
 0x12b   : > { %v1319_v3 = vpop.eup %1318  ;;  %846 = vst [vmem:[%s1666_s21 + $0x58] sm:$0xff] %v814_v42  ;;  %v830_v45 = vsel %vm1645_vm4, %v798_v61, %v1625_v2  ;;  %v796_v24 = vmul.f32 2.0, %v1317_v62 }
 0x12c   : > { %v1321_v63 = vpop.eup %1320  ;;  %862 = vst [vmem:[%s1666_s21 + $0xd8] sm:$0xff] %v830_v45  ;;  %v812_v56 = vsel %vm1645_vm4, %v780_v59, %v1629_v6  ;;  %v785_v60 = vmul.f32 2.0, %v1319_v3 }
 0x12d   : > { %v1323_v7 = vpop.eup %1322  ;;  %844 = vst [vmem:[%s1666_s21 + $0x48] sm:$0xff] %v812_v56  ;;  %v828_v57 = vsel %vm1645_vm4, %v796_v24, %v1636_v9  ;;  %v801_v8 = vmul.f32 2.0, %v1321_v63 }
 0x12e   : > { %v1325_v2 = vpop.eup %1324  ;;  %860 = vst [vmem:[%s1666_s21 + $0xc8] sm:$0xff] %v828_v57  ;;  %v817_v29 = vsel %vm1645_vm4, %v785_v60, %v1639_v10  ;;  %v783_v0 = vmul.f32 2.0, %v1323_v7 }
 0x12f   : > { %v1327_v6 = vpop.eup %1326  ;;  %849 = vst [vmem:[%s1666_s21 + $0x70] sm:$0xff] %v817_v29  ;;  %v833_v5 = vsel %vm1645_vm4, %v801_v8, %v1651_v22  ;;  %v799_v11 = vmul.f32 2.0, %v1325_v2 }
 0x130   : > { %v1329_v12 = vpop.eup %1328  ;;  %865 = vst [vmem:[%s1666_s21 + $0xf0] sm:$0xff] %v833_v5  ;;  %v815_v9 = vsel %vm1645_vm4, %v783_v0, %v1655_v32  ;;  %v786_v30 = vmul.f32 2.0, %v1327_v6 }
 0x131   : > { %v1331_v10 = vpop.eup %1330  ;;  %847 = vst [vmem:[%s1666_s21 + $0x60] sm:$0xff] %v815_v9  ;;  %v831_v22 = vsel %vm1645_vm4, %v799_v11, %v1663_v46  ;;  %v802_v13 = vmul.f32 2.0, %v1329_v12 }
 0x132   : > { %v1333_v1 = vpop.eup %1332  ;;  %863 = vst [vmem:[%s1666_s21 + $0xe0] sm:$0xff] %v831_v22  ;;  %v818_v32 = vsel %vm1645_vm4, %v786_v30, %v1683_v4  ;;  %v784_v14 = vmul.f32 2.0, %v1331_v10 }
 0x133   : > { %850 = vst [vmem:[%s1666_s21 + $0x78] sm:$0xff] %v818_v32  ;;  %v834_v17 = vsel %vm1645_vm4, %v802_v13, %v1695_v16  ;;  %v800_v35 = vmul.f32 2.0, %v1333_v1 }
 0x134   : > { %866 = vst [vmem:[%s1666_s21 + $0xf8] sm:$0xff] %v834_v17  ;;  %v816_v46 = vsel %vm1645_vm4, %v784_v14, %v1702_v19 }
 0x135   : > { %848 = vst [vmem:[%s1666_s21 + $0x68] sm:$0xff] %v816_v46  ;;  %v832_v4 = vsel %vm1645_vm4, %v800_v35, %v1709_v27 }
 0x136   : > { %864 = vst [vmem:[%s1666_s21 + $0xe8] sm:$0xff] %v832_v4 }
 0x137   : > { %1347 = shalt.err (!%p1344_p5)
}
 0x138   : > { %s1348_s7 = scalar_lea.hbm %s1808_s28, 4096  ;;  %s1352_s10 = scalar_lea.hbm %s1871_s3, 8192 }
 0x139   : > { %p1349_p6 = scmp.ne.s32.totalorder %s1808_s28, %s1348_s7  ;;  %p1353_p10 = scmp.lt.s32.totalorder %s1808_s28, %s1871_s3 }
 0x13a   : > { %p1354_p11 = scmp.lt.s32.totalorder %s1352_s10, %s1348_s7 }
 0x13b   : > { %p1350_p7 = pnand %p1349_p6, %p1475_p4 }
 0x13c   : > { %p1355_p12 = por %p1354_p11, %p1353_p10 }
 0x13d   : > { %p1351_p9 = pneg %p1350_p7 }
 0x13f   : > { %p1356_p13 = pnand %p1355_p12, %p1351_p9 }
 0x141   : > { %1359 = shalt.err (!%p1356_p13)
}
 0x142   : > { %s1413_s19 = smov 128   ;;  %s1414_s21 = smov 8  }
 0x143   : > { %1130 = dma.vmem_to_hbm [thread:$0]  (%p1475_p4), %s1810_s26, 4096, %s1808_s28, %s1823_s29, %s1413_s19, %s1413_s19, %s1414_s21  }
 0x144 PF: > { %p1136_p0 = scmp.ge.s32.totalorder %s1410_s17, 2  ;;  %s897_s23 = sand.u32 1, %s1390_s12  }
 0x145   : > { %s898_s15 = scalar_lea.sflag [#allocation3], %s897_s23 }
 0x146   : > { %p1133_p1 = pnand %p1136_p0, %p1482_p8 }
 0x148   : > { %p1134_p2 = pneg %p1133_p1 }
 0x14a   : > { %1385 = dma.done.wait (%p1134_p2), %s898_s15, 4096  }
 0x14b   : > { %1387 = vsyncadd (%p1134_p2), %s898_s15, 4294963200  ;;  %s16_s17 = sadd.s32 1, %s1410_s17   ;;  %s1876_s12 = smov %s1394_s13 }
 0x14c   : > { %p13_p3 = scmp.ge.s32.totalorder %s16_s17, 4   ;;  %s1877_s13 = smov %s1398_s14 }
 0x14d   : > { %s1878_s14 = smov %s1488_s25  ;;  %s1879_s15 = smov %s1406_s16 }
 0x14e   : > { %s1880_s16 = smov %s1882_s20  ;;  %15 = sbr.rel (!%p13_p3) target bundleno = 4 (0x4), region = 73 }
 0x153   :  { %903 = vsyncpa [#allocation3], 1 }
 0x154   :  { %905 = vsyncpa [#allocation3 + $0x1], 1 }

</bundles_post_ra>
